<compile_context>
chip_gen: v6e
topology: v6e:2x2x1
jax: 0.10.0
libtpu: 0.0.40
codegen_flags: <defaults>
</compile_context>

<pallas_src>
import functools

import numpy as np

import jax
import jax.numpy as jnp
from jax import lax
from jax.experimental import pallas as pl
from jax.experimental.pallas import tpu as pltpu


def _nearest_src_indices(in_size: int, out_size: int) -> np.ndarray:
    # PyTorch mode='nearest' (legacy) index rule: src = floor(dst * in/out),
    # clamped to in_size - 1.
    scale = in_size / out_size
    idx = np.floor(np.arange(out_size) * scale).astype(np.int32)
    return np.minimum(idx, in_size - 1)


def _nearest_resize_kernel(ghm_ref, gwt_ref, x_ref, o_ref, *, precision):
    """One grid step: resize TB full (H, W) planes to (OH, OW).

    ghm_ref : (OH, H)       one-hot height-gather matrix (resident across steps)
    gwt_ref : (W, OW)       one-hot width-gather matrix  (resident across steps)
    x_ref   : (TB, H, W)    TB source planes (N*C fused, NCHW layout kept)
    o_ref   : (TB, OH, OW)  TB resized planes
    """
    x = x_ref[...]                                            # (TB, H, W)
    tb = x.shape[0]

    # Width gather on the MXU: batched matmul, OW lands in the lane dimension.
    gwt = jnp.broadcast_to(gwt_ref[...], (tb,) + gwt_ref.shape)   # (TB, W, OW)
    t = lax.dot_general(
        x, gwt,
        dimension_numbers=(((2,), (1,)), ((0,), (0,))),
        preferred_element_type=jnp.float32,
        precision=precision)                                  # (TB, H, OW) f32
    # Every value of t is an exact copy of a value of x, so this cast is exact.
    t = t.astype(x.dtype)

    # Height gather: batched matmul against the (OH, H) one-hot matrix.
    ghm = jnp.broadcast_to(ghm_ref[...], (tb,) + ghm_ref.shape)   # (TB, OH, H)
    out = lax.dot_general(
        ghm, t,
        dimension_numbers=(((2,), (1,)), ((0,), (0,))),
        preferred_element_type=jnp.float32,
        precision=precision)                                  # (TB, OH, OW) f32
    o_ref[...] = out.astype(o_ref.dtype)


def _pick_plane_tile(nc, h, w, oh, ow, itemsize):
    """Largest per-step plane count whose working set stays within ~4 MiB."""
    budget = 4 << 20
    per_plane = (itemsize * (h * w + oh * ow + w * ow + oh * h + h * ow)
                 + 4 * (h * ow + oh * ow))
    tb = max(1, min(nc, budget // max(per_plane, 1)))
    if nc >= 2:
        # Keep >=2 grid steps so v7x's two TensorCores can both get work.
        tb = min(tb, max(1, nc // 2))
    while nc % tb:
        tb -= 1
    return tb


def interpolate_nearest(x, out_size):
    """nn.functional.interpolate(x, size=out_size, mode='nearest') for NCHW x."""
    N, C, H, W = x.shape
    OH, OW = out_size

    # Static (trace-time) PyTorch-'nearest' source indices as one-hot gather
    # matrices.  0/1 weights make the matmul an exact gather.
    h_idx = _nearest_src_indices(H, OH)
    w_idx = _nearest_src_indices(W, OW)
    ghm_np = np.zeros((OH, H), dtype=np.float32)
    ghm_np[np.arange(OH), h_idx] = 1.0
    gwt_np = np.zeros((W, OW), dtype=np.float32)
    gwt_np[w_idx, np.arange(OW)] = 1.0
    ghm = jnp.asarray(ghm_np, dtype=x.dtype)
    gwt = jnp.asarray(gwt_np, dtype=x.dtype)

    # Stay in NCHW: fuse N*C (free, contiguous reshape) and move whole (H, W)
    # planes per grid step; W / OW are the lane dimension inside the kernel.
    NC = N * C
    x_flat = x.reshape(NC, H, W)
    TB = _pick_plane_tile(NC, H, W, OH, OW, x.dtype.itemsize)

    # f32 inputs: multi-pass exact MXU (default would truncate x to bf16 and
    # break the exact-copy semantics of 'nearest'); bf16 inputs: native path.
    precision = (lax.Precision.HIGHEST if x.dtype == jnp.float32
                 else lax.Precision.DEFAULT)

    kernel = functools.partial(_nearest_resize_kernel, precision=precision)

    out_flat = pl.pallas_call(
        kernel,
        out_shape=jax.ShapeDtypeStruct((NC, OH, OW), x.dtype),
        grid_spec=pltpu.PrefetchScalarGridSpec(
            num_scalar_prefetch=0,
            grid=(NC // TB,),
            in_specs=[
                # Gather matrices: one full block each, resident across steps.
                pl.BlockSpec((OH, H), lambda i: (0, 0)),
                pl.BlockSpec((W, OW), lambda i: (0, 0)),
                # TB whole input planes per step (coarse DMA).
                pl.BlockSpec((TB, H, W), lambda i: (i, 0, 0)),
            ],
            out_specs=pl.BlockSpec((TB, OH, OW), lambda i: (i, 0, 0)),
        ),
        compiler_params=pltpu.CompilerParams(
            dimension_semantics=("parallel",),
            vmem_limit_bytes=48 * 1024 * 1024,
        ),
    )(ghm, gwt, x_flat)

    return out_flat.reshape(N, C, OH, OW)


class Interpolate:
    """Pallas equivalent of the PyTorch Interpolate module (mode='nearest')."""

    def __init__(self, out_dims, mode="nearest"):
        if mode != "nearest":
            # TODO(synk): bilinear/bicubic would replace the one-hot matrices
            # with dense blend matrices; only mode='nearest' is implemented.
            raise NotImplementedError("only mode='nearest' is implemented")
        if isinstance(out_dims, int):
            out_dims = (out_dims, out_dims)
        self.size = tuple(out_dims)

    def __call__(self, x):
        return interpolate_nearest(x, self.size)


if __name__ == "__main__":
    key = jax.random.PRNGKey(0)
    # Small GAN-style feature map: batch=2, channels=4, spatial 16x16 -> 32x32.
    x = jax.random.normal(key, (2, 4, 16, 16), dtype=jnp.float32)

    out_dims = (32, 32)
    model = Interpolate(out_dims, mode="nearest")
    fwd = jax.jit(model.__call__)
    y = jax.block_until_ready(fwd(x))
    assert y.shape == (2, 4, 32, 32), y.shape

    # Reference: plain gather with the same PyTorch 'nearest' index rule.
    h_ref = _nearest_src_indices(16, out_dims[0])
    w_ref = _nearest_src_indices(16, out_dims[1])
    ref = x[:, :, h_ref, :][:, :, :, w_ref]
    assert bool(jnp.all(jnp.isfinite(y)))
    assert jnp.allclose(y, ref, atol=1e-6, rtol=1e-6), float(jnp.max(jnp.abs(y - ref)))

    # Non-integer scale factors (still PyTorch 'nearest' semantics).
    y2 = jax.block_until_ready(jax.jit(lambda a: interpolate_nearest(a, (24, 40)))(x))
    ref2 = x[:, :, _nearest_src_indices(16, 24), :][:, :, :, _nearest_src_indices(16, 40)]
    assert y2.shape == (2, 4, 24, 40), y2.shape
    assert jnp.allclose(y2, ref2, atol=1e-6, rtol=1e-6)

    print("KERNEL_OK")
</pallas_src>

<mosaic_0001>
module attributes {stable_mosaic.version = 11 : i64} {
  func.func @_nearest_resize_kernel(%arg0: i32, %arg1: memref<32x16xf32, #tpu.memory_space<vmem>>, %arg2: memref<16x32xf32, #tpu.memory_space<vmem>>, %arg3: memref<4x16x16xf32, #tpu.memory_space<vmem>>, %arg4: memref<4x32x32xf32, #tpu.memory_space<vmem>>) attributes {dimension_semantics = [#tpu.dimension_semantics<parallel>], iteration_bounds = array<i64: 2>, scalar_prefetch = 0 : i64, scratch_operands = 0 : i64, tpu.core_type = #tpu.core_type<tc>, window_params = [{pipeline_mode = #tpu.pipeline_mode<synchronous>, transform_indices = @transform_0, window_bounds = array<i64: 32, 16>}, {pipeline_mode = #tpu.pipeline_mode<synchronous>, transform_indices = @transform_1, window_bounds = array<i64: 16, 32>}, {transform_indices = @transform_2, window_bounds = array<i64: 4, 16, 16>}, {transform_indices = @transform_3, window_bounds = array<i64: 4, 32, 32>}]} {
    %c0 = arith.constant 0 : index
    %c0_0 = arith.constant 0 : index
    %c0_1 = arith.constant 0 : index
    %0 = vector.load %arg3[%c0, %c0_0, %c0_1] : memref<4x16x16xf32, #tpu.memory_space<vmem>>, vector<4x16x16xf32>
    %c0_2 = arith.constant 0 : index
    %c0_3 = arith.constant 0 : index
    %1 = vector.load %arg2[%c0_2, %c0_3] : memref<16x32xf32, #tpu.memory_space<vmem>>, vector<16x32xf32>
    %2 = vector.shape_cast %1 : vector<16x32xf32> to vector<1x16x32xf32>
    %3 = vector.broadcast %2 : vector<1x16x32xf32> to vector<4x16x32xf32>
    %cst = arith.constant dense<0.000000e+00> : vector<4x16x32xf32>
    %4 = tpu.matmul %0, %3, %cst {dimension_numbers = #tpu.dot_dimension_numbers<[2], [1], [1], [2], [0, 0, 0, 1, 1, 2], [0], [0]>, precision = #tpu.contract_precision<fp32>} : vector<4x16x16xf32>, vector<4x16x32xf32>, vector<4x16x32xf32> -> vector<4x16x32xf32>
    %c0_4 = arith.constant 0 : index
    %c0_5 = arith.constant 0 : index
    %5 = vector.load %arg1[%c0_4, %c0_5] : memref<32x16xf32, #tpu.memory_space<vmem>>, vector<32x16xf32>
    %6 = vector.shape_cast %5 : vector<32x16xf32> to vector<1x32x16xf32>
    %7 = vector.broadcast %6 : vector<1x32x16xf32> to vector<4x32x16xf32>
    %cst_6 = arith.constant dense<0.000000e+00> : vector<4x32x32xf32>
    %8 = tpu.matmul %7, %4, %cst_6 {dimension_numbers = #tpu.dot_dimension_numbers<[2], [1], [1], [2], [0, 0, 0, 1, 1, 2], [0], [0]>, precision = #tpu.contract_precision<fp32>} : vector<4x32x16xf32>, vector<4x16x32xf32>, vector<4x32x32xf32> -> vector<4x32x32xf32>
    %c0_7 = arith.constant 0 : index
    %c0_8 = arith.constant 0 : index
    %c0_9 = arith.constant 0 : index
    %9 = vector.load %arg4[%c0_7, %c0_8, %c0_9] : memref<4x32x32xf32, #tpu.memory_space<vmem>>, vector<4x32x32xf32>
    tpu.vector_store %arg4[%c0_7, %c0_8, %c0_9], %8 {strides = array<i32>} : memref<4x32x32xf32, #tpu.memory_space<vmem>>, vector<4x32x32xf32>,
    return
  }
  func.func @transform_0(%arg0: i32) -> (i32, i32) {
    %c0_i32 = arith.constant 0 : i32
    %c0_i32_0 = arith.constant 0 : i32
    %c0_i32_1 = arith.constant 0 : i32
    return %c0_i32, %c0_i32_0 : i32, i32
  }
  func.func @transform_1(%arg0: i32) -> (i32, i32) {
    %c0_i32 = arith.constant 0 : i32
    %c0_i32_0 = arith.constant 0 : i32
    %c0_i32_1 = arith.constant 0 : i32
    return %c0_i32, %c0_i32_0 : i32, i32
  }
  func.func @transform_2(%arg0: i32) -> (i32, i32, i32) {
    %c0_i32 = arith.constant 0 : i32
    %c0_i32_0 = arith.constant 0 : i32
    %c0_i32_1 = arith.constant 0 : i32
    return %arg0, %c0_i32, %c0_i32_0 : i32, i32, i32
  }
  func.func @transform_3(%arg0: i32) -> (i32, i32, i32) {
    %c0_i32 = arith.constant 0 : i32
    %c0_i32_0 = arith.constant 0 : i32
    %c0_i32_1 = arith.constant 0 : i32
    return %arg0, %c0_i32, %c0_i32_0 : i32, i32, i32
  }
}

</mosaic_0001>

<bundles_post_ra>
// kernel: a_call__.1
= control target key start
LH: loop header
LB: loop body
LE: loop exit
PB: predicated region body
PF: predicated region fallthrough
CT: control target
= control target key end

     0   :  { %8 = vsyncpa [#allocation3], 0  ;;  %s6359_s0 = inlined_call_operand.hbm [shape: f32[32,16], index: 0, kind: input, shape index: {}]   ;;  %s6360_s1 = inlined_call_operand.hbm [shape: f32[16,32], index: 1, kind: input, shape index: {}]   ;;  %s6361_s2 = inlined_call_operand.hbm [shape: f32[8,16,16], index: 2, kind: input, shape index: {}]   ;;  %s6362_s3 = inlined_call_operand.hbm [shape: f32[8,32,32], index: 3, kind: output, shape index: {}]  }
   0x1   :  { %9 = vsyncpa [#allocation6], 0 }
   0x2   :  { %10 = vsyncpa [#allocation4], 0 }
   0x3   :  { %12 = vsyncpa [#allocation4 + $0x1], 0  ;;  %s5679_s12 = smov 0   ;;  %s5681_s13 = smov 0  }
   0x4   :  { %s5683_s14 = smov 0   ;;  %s5685_s15 = smov 0  }
   0x5 LB: > { %s5700_s16 = sadd.s32 4294967295, %s5649_s15   ;;  %s4754_s17 = sadd.s32 4294967294, %s5649_s15   ;;  %s5649_s15 = sphi %s5685_s15, %s6386_s15   ;;  %s5645_s14 = sphi %s5683_s14, %s6385_s14   ;;  %s5641_s13 = sphi %s5681_s13, %s6384_s13   ;;  %s5637_s12 = sphi %s5679_s12, %s6383_s12  }
   0x6   : > { %s5704_s18 = sadd.s32 1, %s5649_s15   ;;  %s67_s19 = sadd.s32 1, %s5645_s14 }
   0x7   : > { %s64_s20 = ssub.s32 %s5649_s15, %s5704_s18  ;;  %p74_p0 = scmp.ne.s32.totalorder %s5645_s14, %s5641_s13 }
   0x8   : > { %p65_p1 = scmp.eq.s32.totalorder %s64_s20, 0  ;;  %p75_p2 = scmp.eq.s32.totalorder %s5649_s15, 0 }
   0x9   : > { %p80_p3 = scmp.ne.s32.totalorder %s5641_s13, %s5637_s12  ;;  %p6364_p4 = scmp.eq.s32.totalorder %s5700_s16, 0 }
   0xa   : > { %s5716_s21 = scalar_select %p65_p1, %s5645_s14, %s67_s19  }
   0xb   : > { %p5718_p5 = por %p75_p2, %p74_p0  ;;  %p5724_p6 = por %p6364_p4, %p80_p3 }
   0xc   : > { %p104_p7 = scmp.eq.s32.totalorder %s5700_s16, 1  ;;  %p110_p8 = scmp.eq.s32.totalorder %s4754_s17, 1 }
   0xd   : > { %s6368_s23 = scalar_select %p5724_p6, 1, 0 }
   0xe   : > { %p4755_p9 = scmp.ge.s32.totalorder %s5649_s15, 1  ;;  %p117_p10 = scmp.lt.s32.totalorder %s5649_s15, 3 }
   0xf   : > { %p5731_p11 = por %p104_p7, %p74_p0  ;;  %p5735_p12 = por %p110_p8, %p80_p3 }
  0x10   : > { %p5739_p13 = pnand %p4755_p9, %p117_p10  ;;  %s5651_s27 = smov [#allocation2]  }
  0x11   : > { %s6369_s24 = scalar_select %p5731_p11, 1, 0 }
  0x12   : > { %s6370_s25 = scalar_select %p5735_p12, 1, 0 }
  0x13   : > { %s6371_s26 = scalar_select %p5739_p13, 1, 0 }
  0x14   : > { %p5438_p1 = pneg %p5739_p13  ;;  %s129_s28 = sshll.u32 %s5651_s27, 4  ;;  %s130_s28 = int_to_ptr.vmem [resolvable:$true] %s129_s28 }
  0x15   : > { %p5455_p3 = scmp.lt.s32.totalorder %s5649_s15, 2  ;;  %s5652_s30 = smov [#allocation5]  }
  0x16   : > { %p5747_p2 = pnand %p5438_p1, %p6364_p4  ;;  %s142_s4 = sshll.u32 %s5652_s30, 4  ;;  %s143_s4 = int_to_ptr.vmem [resolvable:$true] %s142_s4 }
  0x17   : > { %s5508_s5 = scalar_lea.vmem %s130_s28, 512  ;;  %p5516_p12 = scmp.lt.s32.totalorder %s130_s28, %s130_s28 }
  0x18   : > { %p5499_p7 = pneg %p5747_p2  ;;  %p5509_p8 = scmp.ne.s32.totalorder %s130_s28, %s5508_s5 }
  0x19   : > { %p5517_p11 = scmp.lt.s32.totalorder %s5508_s5, %s5508_s5 }
  0x1a   : > { %p5511_p9 = pnand %p5509_p8, %p5499_p7 }
  0x1b   : > { %p5518_p1 = por %p5517_p11, %p5516_p12 }
  0x1c   : > { %p5512_p10 = pneg %p5511_p9 }
  0x1e   : > { %p5519_p4 = pnand %p5518_p1, %p5512_p10 }
  0x20   : > { %5522 = shalt.err (!%p5519_p4)
}
  0x21   : > { %s5653_s6 = smov 128   ;;  %s5654_s7 = smov 8  }
  0x22   : > { %5441 = dma.hbm_to_vmem [thread:$0]  (!%p5747_p2), %s6359_s0, 512, %s130_s28, [#allocation3], %s5653_s6, %s5653_s6, %s5654_s7  }
  0x23   : > { %p5770_p8 = pnand %p5455_p3, %p5718_p5  ;;  %s5534_s11 = scalar_lea.vmem %s143_s4, 256 }
  0x24   : > { %p5535_p4 = scmp.ne.s32.totalorder %s143_s4, %s5534_s11  ;;  %p5542_p9 = scmp.lt.s32.totalorder %s143_s4, %s143_s4 }
  0x25   : > { %p5543_p10 = scmp.lt.s32.totalorder %s5534_s11, %s5534_s11 }
  0x26   : > { %p5537_p11 = pnand %p5535_p4, %p5499_p7 }
  0x27   : > { %p5544_p1 = por %p5543_p10, %p5542_p9 }
  0x28   : > { %p5538_p12 = pneg %p5537_p11 }
  0x2a   : > { %p5545_p0 = pnand %p5544_p1, %p5538_p12 }
  0x2c   : > { %5548 = shalt.err (!%p5545_p0)
}
  0x2d   : > { %5444 = dma.hbm_to_vmem [thread:$0]  (!%p5747_p2), %s6360_s1, 256, %s143_s4, [#allocation6], %s5653_s6, %s5653_s6, %s5654_s7  }
  0x2e   : > { %s156_s20 = sand.u32 1, %s5649_s15   ;;  %s158_s22 = sand.u32 1, %s5645_s14  }
  0x2f   : > { %s4759_s27 = sshll.u32 %s158_s22, 6  ;;  %s4775_s28 = sshll.u32 %s5649_s15, 10 }
  0x30   : > { %s5791_s8 = scalar_lea.hbm %s6361_s2, %s4775_s28  ;;  %s160_s29 = scalar_lea.vmem [#allocation7], %s4759_s27 }
  0x31   : > { %s168_s9 = sshll.u32 %s160_s29, 4  ;;  %s5795_s11 = scalar_lea.sflag [#allocation3], %s156_s20  ;;  %s5793_s9 = int_to_ptr.vmem [resolvable:$true] %s168_s9 }
  0x32   : > { %s5549_s17 = scalar_lea.hbm %s5791_s8, 1024  ;;  %p5551_p2 = pneg %p5770_p8 }
  0x33   : > { %p5550_p5 = scmp.ne.s32.totalorder %s5791_s8, %s5549_s17  ;;  %s5554_s22 = scalar_lea.hbm %s6361_s2, 2048 }
  0x34   : > { %p5555_p7 = scmp.lt.s32.totalorder %s5791_s8, %s6361_s2  ;;  %p5556_p4 = scmp.lt.s32.totalorder %s5554_s22, %s5549_s17 }
  0x35   : > { %p5552_p0 = pnand %p5551_p2, %p5550_p5 }
  0x36   : > { %p5557_p11 = por %p5556_p4, %p5555_p7 }
  0x37   : > { %p5553_p3 = pneg %p5552_p0 }
  0x39   : > { %p5558_p12 = pnand %p5557_p11, %p5553_p3 }
  0x3b   : > { %5561 = shalt.err (!%p5558_p12)
}
  0x3c   : > { %s5562_s20 = scalar_lea.vmem %s5793_s9, 1024  ;;  %s5655_s27 = smov [#allocation7]  }
  0x3d   : > { %p5563_p9 = scmp.ne.s32.totalorder %s5793_s9, %s5562_s20  ;;  %s5567_s5 = sshll.u32 %s5655_s27, 4  ;;  %s5568_s5 = int_to_ptr.vmem [resolvable:$false] %s5567_s5 }
  0x3e   : > { %s5569_s29 = scalar_lea.vmem %s5568_s5, 2048  ;;  %p5570_p5 = scmp.lt.s32.totalorder %s5793_s9, %s5568_s5 }
  0x3f   : > { %p5565_p10 = pnand %p5563_p9, %p5551_p2  ;;  %p5571_p0 = scmp.lt.s32.totalorder %s5569_s29, %s5562_s20 }
  0x41   : > { %p5566_p1 = pneg %p5565_p10  ;;  %p5572_p6 = por %p5571_p0, %p5570_p5 }
  0x43   : > { %p5573_p13 = pnand %p5572_p6, %p5566_p1 }
  0x45   : > { %5576 = shalt.err (!%p5573_p13)
}
  0x46   : > { %5448 = dma.hbm_to_vmem [thread:$0]  (!%p5770_p8), %s5791_s8, 1024, %s5793_s9, %s5795_s11, %s5653_s6, %s5653_s6, %s5654_s7  }
  0x47   : > { %p6374_p2 = scmp.ne.s32.totalorder %s6371_s26, 0 }
  0x48   : > { %p6375_p3 = scmp.eq.s32.totalorder (!%p6374_p2), %s5700_s16, 0 }
  0x49   : > { %180 = sbr.rel (%p6374_p2) target bundleno = 643 (0x283), region = 32 }
  0x4e   : > { %5620 = dma.done.wait (%p6375_p3), [#allocation3], 512   ;;  %p6376_p7 = pmov %p6375_p3 }
  0x4f   : > { %p6377_p6 = pmov %p6375_p3 }
  0x50   : > { %5622 = vsyncadd (%p6376_p7), [#allocation3], 4294966784 }
  0x51   : > { %5624 = dma.done.wait (%p6377_p6), [#allocation6], 256   ;;  %p6378_p13 = pmov %p6375_p3 }
  0x52   : > { %s190_s10 = sand.u32 1, %s5700_s16   ;;  %s5831_s6 = sand.u32 1, %s5641_s13  }
  0x53   : > { %5626 = vsyncadd (%p6378_p13), [#allocation6], 4294967040  ;;  %s4766_s26 = sshll.u32 %s5831_s6, 6  ;;  %s191_s7 = scalar_lea.sflag [#allocation3], %s190_s10 }
  0x54   : > { %s5834_s8 = scalar_lea.vmem [#allocation7], %s4766_s26  ;;  %p6379_p8 = scmp.ne.s32.totalorder %s6368_s23, 0 }
  0x56   : > { %5628 = dma.done.wait (%p6379_p8), %s191_s7, 1024  }
  0x57   : > { %5630 = vsyncadd (%p6379_p8), %s191_s7, 4294966272  ;;  %vm229_vm0 = vcmask 130048   ;;  %v228_v0 = vld [vmem:[#allocation5 + $0x8] sm:$0xff]  ;;  %v227_v1 = vld [vmem:[#allocation5] sm:$0xff]  ;;  %s4767_s23 = sshll.u32 %s5831_s6, 7  ;;  %vm4630_vm1 = vcmask 261120  }
  0x58   : > { %v219_v2 = vld [vmem:[%s5834_s8] sm:$0xff]  ;;  %v5841_v3 = vand.u32 4294901760, %v228_v0  ;;  %v5843_v4 = vand.u32 4294901760, %v227_v1  ;;  %v220_v6 = vld [vmem:[%s5834_s8 + $0x8] sm:$0xff]  ;;  %v221_v12 = vld [vmem:[%s5834_s8 + $0x10] sm:$0xff]  ;;  %s6275_s9 = scalar_lea.vmem [#allocation8], %s4767_s23 }
  0x59   : > { %v231_v5 = vsel %vm229_vm0, %v219_v2, 0  ;;  %v234_v8 = vsel %vm229_vm0, %v220_v6, 0  ;;  %v222_v14 = vld [vmem:[%s5834_s8 + $0x18] sm:$0xff]  ;;  %v739_v19 = vsel %vm229_vm0, %v221_v12, 0  ;;  %v223_v36 = vld [vmem:[%s5834_s8 + $0x20] sm:$0xff]  ;;  %v224_v39 = vld [vmem:[%s5834_s8 + $0x28] sm:$0xff] }
  0x5a   : > { %v5847_v7 = vand.u32 4294901760, %v231_v5  ;;  %5018 = vmatprep.subr.mxu0 %v5841_v3  ;;  %v5852_v9 = vsub.f32 %v228_v0, %v5841_v3  ;;  %v5854_v10 = vand.u32 4294901760, %v234_v8  ;;  %v5857_v11 = vsub.f32 %v227_v1, %v5843_v4  ;;  %v225_v51 = vld [vmem:[%s5834_s8 + $0x30] sm:$0xff]  ;;  %v226_v53 = vld [vmem:[%s5834_s8 + $0x38] sm:$0xff]  ;;  %v2264_v12 = vld [vmem:[#allocation2 + $0x10] sm:$0xff]  ;;  %s4777_s11 = sshll.u32 %s5700_s16, 11 }
  0x5b   : > { %5019 = vmatpush3.msra.mxu0 %v5841_v3  ;;  %v742_v23 = vsel %vm229_vm0, %v222_v14, 0  ;;  %v5884_v28 = vand.u32 4294901760, %v739_v19  ;;  %v1247_v40 = vsel %vm229_vm0, %v223_v36, 0  ;;  %v1250_v42 = vsel %vm229_vm0, %v224_v39, 0  ;;  %v2262_v6 = vld [vmem:[#allocation2] sm:$0xff]  ;;  %s4662_s17 = sshll.u32 %s6275_s9, 4  ;;  %s6310_s22 = scalar_lea.hbm %s6362_s3, %s4777_s11  ;;  %s6312_s17 = int_to_ptr.vmem [resolvable:$true] %s4662_s17 }
  0x5c   : > { %v304_v13 = vsub.f32 %v231_v5, %v5847_v7  ;;  %5029 = vmatprep.mubr.f32.mxu1 %v5847_v7  ;;  %5020 = vmatprep.subr.mxu0 %v5843_v4  ;;  %v5866_v15 = vand.u32 4294901760, %v5852_v9  ;;  %v314_v16 = vsub.f32 %v234_v8, %v5854_v10  ;;  %v5870_v17 = vand.u32 4294901760, %v5857_v11  ;;  %s4648_s16 = scalar_lea.sflag [#allocation4], %s5831_s6  ;;  %s5577_s28 = scalar_lea.vmem %s6312_s17, 2048 }
  0x5d   : > { %5021 = vmatpush3.msra.mxu0 %v5843_v4  ;;  %v5886_v30 = vand.u32 4294901760, %v742_v23  ;;  %v5892_v32 = vsub.f32 %v739_v19, %v5884_v28  ;;  %v5927_v44 = vand.u32 4294901760, %v1247_v40  ;;  %v5933_v45 = vand.u32 4294901760, %v1250_v42  ;;  %p5578_p4 = scmp.ne.s32.totalorder %s6312_s17, %s5577_s28  ;;  %p6380_p11 = scmp.ne.s32.totalorder %s6369_s24, 0 }
  0x5e   : > { %v305_v18 = vand.u32 4294901760, %v304_v13  ;;  %v355_v20 = vsub.f32 %v5852_v9, %v5866_v15  ;;  %v315_v21 = vand.u32 4294901760, %v314_v16  ;;  %v362_v22 = vsub.f32 %v5857_v11, %v5870_v17  ;;  %5032 = vmatprep.subr.mxu0 %v5852_v9  ;;  %s5656_s30 = smov [#allocation8]  }
  0x5f   : > { %v5897_v33 = vsub.f32 %v742_v23, %v5886_v30  ;;  %v813_v34 = vand.u32 4294901760, %v5892_v32  ;;  %v5938_v46 = vsub.f32 %v1247_v40, %v5927_v44  ;;  %v5945_v47 = vsub.f32 %v1250_v42, %v5933_v45  ;;  %p5579_p12 = pnand %p5578_p4, %p6380_p11  ;;  %s5581_s20 = sshll.u32 %s5656_s30, 4  ;;  %s5582_s20 = int_to_ptr.vmem [resolvable:$false] %s5581_s20 }
  0x60   : > { %v306_v24 = vsub.f32 %v304_v13, %v305_v18  ;;  %v5880_v25 = vand.u32 4294901760, %v355_v20  ;;  %v316_v26 = vsub.f32 %v314_v16, %v315_v21  ;;  %v5882_v27 = vand.u32 4294901760, %v362_v22  ;;  %s5583_s27 = scalar_lea.vmem %s5582_s20, 4096  ;;  %p5584_p10 = scmp.lt.s32.totalorder %s6312_s17, %s5582_s20 }
  0x61   : > { %v823_v35 = vand.u32 4294901760, %v5897_v33  ;;  %v814_v37 = vsub.f32 %v5892_v32, %v813_v34  ;;  %v1321_v48 = vand.u32 4294901760, %v5938_v46  ;;  %v1331_v49 = vand.u32 4294901760, %v5945_v47  ;;  %p5580_p9 = pneg %p5579_p12  ;;  %p5585_p1 = scmp.lt.s32.totalorder %s5583_s27, %s5577_s28 }
  0x62   : > { %v307_v29 = vand.u32 4294901760, %v306_v24  ;;  %5025 = vmatprep.subr.mxu1 %v5880_v25  ;;  %v317_v31 = vand.u32 4294901760, %v316_v26  ;;  %v1755_v54 = vsel %vm229_vm0, %v225_v51, 0  ;;  %v1758_v56 = vsel %vm229_vm0, %v226_v53, 0 }
  0x63   : > { %5026 = vmatpush3.msra.mxu1 %v5880_v25  ;;  %v824_v38 = vsub.f32 %v5897_v33, %v823_v35  ;;  %v815_v41 = vand.u32 4294901760, %v814_v37  ;;  %v1322_v50 = vsub.f32 %v5938_v46, %v1321_v48  ;;  %v1332_v52 = vsub.f32 %v5945_v47, %v1331_v49  ;;  %p5586_p5 = por %p5585_p1, %p5584_p10 }
  0x64   : > { %5022 = vmatprep.mubr.f32.mxu0 %v307_v29  ;;  %5027 = vmatprep.subr.mxu1 %v5882_v27  ;;  %v5977_v58 = vand.u32 4294901760, %v1755_v54  ;;  %v5982_v59 = vand.u32 4294901760, %v1758_v56 }
  0x65   : > { %5023 = vmatmul.mubr.f32.vlgmr.msra.gmra.mxu0 %v317_v31  ;;  %5028 = vmatpush3.msra.mxu1 %v5882_v27  ;;  %v825_v43 = vand.u32 4294901760, %v824_v38  ;;  %v1323_v55 = vand.u32 4294901760, %v1322_v50  ;;  %v1333_v57 = vand.u32 4294901760, %v1332_v52  ;;  %p5587_p0 = pnand %p5586_p5, %p5580_p9 }
  0x66   : > { %5033 = vmatpush3.msra.mxu0 %v5852_v9  ;;  %5030 = vmatmul.mubr.f32.vlgmr.msra.gmra.mxu1 %v5854_v10  ;;  %v1828_v60 = vsub.f32 %v1755_v54, %v5977_v58  ;;  %v1838_v61 = vsub.f32 %v1758_v56, %v5982_v59 }
  0x67   : > { %5034 = vmatprep.subr.mxu0 %v5857_v11  ;;  %5039 = vmatprep.subr.mxu1 %v5841_v3 }
  0x68   : > { %5035 = vmatpush3.msra.mxu0 %v5857_v11  ;;  %5036 = vmatprep.mubr.f32.mxu0 %v304_v13  ;;  %v1829_v62 = vand.u32 4294901760, %v1828_v60  ;;  %v1839_v63 = vand.u32 4294901760, %v1838_v61 }
  0x69   : > { %5040 = vmatpush3.msra.mxu1 %v5841_v3  ;;  %5037 = vmatmul.mubr.f32.vlgmr.msra.gmra.mxu0 %v314_v16  ;;  %v2265_v16 = vld [vmem:[#allocation2 + $0x18] sm:$0xff] }
  0x6a   : > { %5041 = vmatprep.subr.mxu1 %v5843_v4  ;;  %5046 = vmatprep.subr.mxu0 %v5866_v15  ;;  %v1830_v0 = vsub.f32 %v1828_v60, %v1829_v62  ;;  %v1840_v1 = vsub.f32 %v1838_v61, %v1839_v63  ;;  %v2276_v23 = vsel %vm229_vm0, %v2265_v16, 0 }
  0x6b   : > { %5042 = vmatpush3.msra.mxu1 %v5843_v4  ;;  %5043 = vmatprep.mubr.f32.mxu1 %v305_v18  ;;  %v6069_v29 = vand.u32 4294901760, %v2276_v23 }
  0x6c   : > { %5047 = vmatpush3.msra.mxu0 %v5866_v15  ;;  %5044 = vmatmul.mubr.f32.vlgmr.msra.gmra.mxu1 %v315_v21  ;;  %v1831_v2 = vand.u32 4294901760, %v1830_v0  ;;  %v1841_v5 = vand.u32 4294901760, %v1840_v1 }
  0x6d   : > { %5048 = vmatprep.subr.mxu0 %v5870_v17  ;;  %5053 = vmatprep.subr.mxu1 %v5841_v3  ;;  %v6078_v38 = vsub.f32 %v2276_v23, %v6069_v29 }
  0x6e   : > { %5049 = vmatpush3.msra.mxu0 %v5870_v17  ;;  %5050 = vmatprep.mubr.f32.mxu0 %v5847_v7 }
  0x6f   : > { %5054 = vmatpush3.msra.mxu1 %v5841_v3  ;;  %5051 = vmatmul.mubr.f32.vlgmr.msra.gmra.mxu0 %v5854_v10 }
  0x70   : > { %5055 = vmatprep.subr.mxu1 %v5843_v4  ;;  %5060 = vmatprep.subr.mxu0 %v5841_v3 }
  0x71   : > { %5056 = vmatpush3.msra.mxu1 %v5843_v4  ;;  %5057 = vmatprep.mubr.f32.mxu1 %v5847_v7  ;;  %v2267_v7 = vsel %vm229_vm0, %v2262_v6, 0 }
  0x72   : > { %5061 = vmatpush3.msra.mxu0 %v5841_v3  ;;  %5058 = vmatmul.mubr.f32.vlgmr.msra.gmra.mxu1 %v5854_v10  ;;  %v6045_v8 = vand.u32 4294901760, %v2267_v7 }
  0x73   : > { %5062 = vmatprep.subr.mxu0 %v5843_v4  ;;  %5067 = vmatprep.subr.mxu1 %v5880_v25 }
  0x74   : > { %5063 = vmatpush3.msra.mxu0 %v5843_v4  ;;  %5064 = vmatprep.mubr.f32.mxu0 %v815_v41 }
  0x75   : > { %5068 = vmatpush3.msra.mxu1 %v5880_v25  ;;  %5065 = vmatmul.mubr.f32.vlgmr.msra.gmra.mxu0 %v825_v43 }
  0x76   : > { %5069 = vmatprep.subr.mxu1 %v5882_v27  ;;  %5074 = vmatprep.subr.mxu0 %v5852_v9 }
  0x77   : > { %5070 = vmatpush3.msra.mxu1 %v5882_v27  ;;  %5071 = vmatprep.mubr.f32.mxu1 %v5884_v28 }
  0x78   : > { %5075 = vmatpush3.msra.mxu0 %v5852_v9  ;;  %5072 = vmatmul.mubr.f32.vlgmr.msra.gmra.mxu1 %v5886_v30 }
  0x79   : > { %5076 = vmatprep.subr.mxu0 %v5857_v11  ;;  %5081 = vmatprep.subr.mxu1 %v5841_v3 }
  0x7a   : > { %5077 = vmatpush3.msra.mxu0 %v5857_v11  ;;  %5078 = vmatprep.mubr.f32.mxu0 %v5892_v32 }
  0x7b   : > { %5082 = vmatpush3.msra.mxu1 %v5841_v3  ;;  %5079 = vmatmul.mubr.f32.vlgmr.msra.gmra.mxu0 %v5897_v33 }
  0x7c   : > { %5083 = vmatprep.subr.mxu1 %v5843_v4  ;;  %5088 = vmatprep.subr.mxu0 %v5866_v15 }
  0x7d   : > { %5084 = vmatpush3.msra.mxu1 %v5843_v4  ;;  %5085 = vmatprep.mubr.f32.mxu1 %v813_v34 }
  0x7e   : > { %5089 = vmatpush3.msra.mxu0 %v5866_v15  ;;  %5086 = vmatmul.mubr.f32.vlgmr.msra.gmra.mxu1 %v823_v35 }
  0x7f   : > { %5090 = vmatprep.subr.mxu0 %v5870_v17  ;;  %5095 = vmatprep.subr.mxu1 %v5841_v3 }
  0x80   : > { %5091 = vmatpush3.msra.mxu0 %v5870_v17  ;;  %5092 = vmatprep.mubr.f32.mxu0 %v5884_v28 }
  0x81   : > { %5096 = vmatpush3.msra.mxu1 %v5841_v3  ;;  %5093 = vmatmul.mubr.f32.vlgmr.msra.gmra.mxu0 %v5886_v30 }
  0x82   : > { %5097 = vmatprep.subr.mxu1 %v5843_v4  ;;  %5099 = vmatprep.mubr.f32.mxu1 %v5884_v28 }
  0x83   : > { %5098 = vmatpush3.msra.mxu1 %v5843_v4  ;;  %5102 = vmatprep.subr.mxu0 %v5841_v3 }
  0x84   : > { %5100 = vmatmul.mubr.f32.vlgmr.msra.gmra.mxu1 %v5886_v30  ;;  %5103 = vmatpush3.msra.mxu0 %v5841_v3 }
  0x85   : > { %5109 = vmatprep.subr.mxu1 %v5880_v25  ;;  %5104 = vmatprep.subr.mxu0 %v5843_v4 }
  0x86   : > { %5106 = vmatprep.mubr.f32.mxu0 %v1323_v55  ;;  %5105 = vmatpush3.msra.mxu0 %v5843_v4 }
  0x87   : > { %5110 = vmatpush3.msra.mxu1 %v5880_v25  ;;  %5107 = vmatmul.mubr.f32.vlgmr.msra.gmra.mxu0 %v1333_v57 }
  0x88   : > { %5111 = vmatprep.subr.mxu1 %v5882_v27  ;;  %5116 = vmatprep.subr.mxu0 %v5852_v9 }
  0x89   : > { %5112 = vmatpush3.msra.mxu1 %v5882_v27  ;;  %5113 = vmatprep.mubr.f32.mxu1 %v5927_v44 }
  0x8a   : > { %5117 = vmatpush3.msra.mxu0 %v5852_v9  ;;  %5114 = vmatmul.mubr.f32.vlgmr.msra.gmra.mxu1 %v5933_v45 }
  0x8b   : > { %5118 = vmatprep.subr.mxu0 %v5857_v11  ;;  %5123 = vmatprep.subr.mxu1 %v5841_v3 }
  0x8c   : > { %5119 = vmatpush3.msra.mxu0 %v5857_v11  ;;  %5120 = vmatprep.mubr.f32.mxu0 %v5938_v46  ;;  %v6086_v46 = vand.u32 4294901760, %v6078_v38 }
  0x8d   : > { %5124 = vmatpush3.msra.mxu1 %v5841_v3  ;;  %5121 = vmatmul.mubr.f32.vlgmr.msra.gmra.mxu0 %v5945_v47 }
  0x8e   : > { %5125 = vmatprep.subr.mxu1 %v5843_v4  ;;  %5130 = vmatprep.subr.mxu0 %v5866_v15  ;;  %v2378_v56 = vsub.f32 %v6078_v38, %v6086_v46 }
  0x8f   : > { %5126 = vmatpush3.msra.mxu1 %v5843_v4  ;;  %5127 = vmatprep.mubr.f32.mxu1 %v1321_v48 }
  0x90   : > { %5131 = vmatpush3.msra.mxu0 %v5866_v15  ;;  %5128 = vmatmul.mubr.f32.vlgmr.msra.gmra.mxu1 %v1331_v49  ;;  %v6107_v1 = vand.u32 4294901760, %v2378_v56 }
  0x91   : > { %5132 = vmatprep.subr.mxu0 %v5870_v17  ;;  %5137 = vmatprep.subr.mxu1 %v5841_v3 }
  0x92   : > { %5133 = vmatpush3.msra.mxu0 %v5870_v17  ;;  %5134 = vmatprep.mubr.f32.mxu0 %v5927_v44 }
  0x93   : > { %5138 = vmatpush3.msra.mxu1 %v5841_v3  ;;  %5135 = vmatmul.mubr.f32.vlgmr.msra.gmra.mxu0 %v5933_v45 }
  0x94   : > { %5139 = vmatprep.subr.mxu1 %v5843_v4  ;;  %5141 = vmatprep.mubr.f32.mxu1 %v5927_v44 }
  0x95   : > { %5140 = vmatpush3.msra.mxu1 %v5843_v4  ;;  %5144 = vmatprep.subr.mxu0 %v5841_v3 }
  0x96   : > { %5142 = vmatmul.mubr.f32.vlgmr.msra.gmra.mxu1 %v5933_v45  ;;  %5145 = vmatpush3.msra.mxu0 %v5841_v3 }
  0x97   : > { %5151 = vmatprep.subr.mxu1 %v5880_v25  ;;  %5146 = vmatprep.subr.mxu0 %v5843_v4 }
  0x98   : > { %5148 = vmatprep.mubr.f32.mxu0 %v1831_v2  ;;  %5147 = vmatpush3.msra.mxu0 %v5843_v4 }
  0x99   : > { %5152 = vmatpush3.msra.mxu1 %v5880_v25  ;;  %5149 = vmatmul.mubr.f32.vlgmr.msra.gmra.mxu0 %v1841_v5 }
  0x9a   : > { %5153 = vmatprep.subr.mxu1 %v5882_v27  ;;  %5158 = vmatprep.subr.mxu0 %v5852_v9 }
  0x9b   : > { %5154 = vmatpush3.msra.mxu1 %v5882_v27  ;;  %5155 = vmatprep.mubr.f32.mxu1 %v5977_v58 }
  0x9c   : > { %5159 = vmatpush3.msra.mxu0 %v5852_v9  ;;  %5156 = vmatmul.mubr.f32.vlgmr.msra.gmra.mxu1 %v5982_v59  ;;  %v6048_v9 = vsub.f32 %v2267_v7, %v6045_v8 }
  0x9d   : > { %5160 = vmatprep.subr.mxu0 %v5857_v11  ;;  %5165 = vmatprep.subr.mxu1 %v5841_v3 }
  0x9e   : > { %5161 = vmatpush3.msra.mxu0 %v5857_v11  ;;  %5162 = vmatprep.mubr.f32.mxu0 %v1828_v60  ;;  %v2263_v11 = vld [vmem:[#allocation2 + $0x8] sm:$0xff] }
  0x9f   : > { %5166 = vmatpush3.msra.mxu1 %v5841_v3  ;;  %5163 = vmatmul.mubr.f32.vlgmr.msra.gmra.mxu0 %v1838_v61  ;;  %v2270_v14 = vsel %vm229_vm0, %v2263_v11, 0 }
  0xa0   : > { %5167 = vmatprep.subr.mxu1 %v5843_v4  ;;  %5172 = vmatprep.subr.mxu0 %v5866_v15  ;;  %v6061_v20 = vand.u32 4294901760, %v2270_v14 }
  0xa1   : > { %5168 = vmatpush3.msra.mxu1 %v5843_v4  ;;  %5169 = vmatprep.mubr.f32.mxu1 %v1829_v62 }
  0xa2   : > { %5173 = vmatpush3.msra.mxu0 %v5866_v15  ;;  %5170 = vmatmul.mubr.f32.vlgmr.msra.gmra.mxu1 %v1839_v63  ;;  %v2273_v15 = vsel %vm229_vm0, %v2264_v12, 0  ;;  %v6067_v28 = vsub.f32 %v2270_v14, %v6061_v20 }
  0xa3   : > { %5174 = vmatprep.subr.mxu0 %v5870_v17  ;;  %5179 = vmatprep.subr.mxu1 %v5841_v3  ;;  %v6063_v22 = vand.u32 4294901760, %v2273_v15 }
  0xa4   : > { %5175 = vmatpush3.msra.mxu0 %v5870_v17  ;;  %5176 = vmatprep.mubr.f32.mxu0 %v5977_v58  ;;  %v6075_v37 = vand.u32 4294901760, %v6067_v28 }
  0xa5   : > { %5180 = vmatpush3.msra.mxu1 %v5841_v3  ;;  %5177 = vmatmul.mubr.f32.vlgmr.msra.gmra.mxu0 %v5982_v59  ;;  %v6052_v3 = vand.u32 4294901760, %v6048_v9  ;;  %v6072_v32 = vsub.f32 %v2273_v15, %v6063_v22 }
  0xa6   : > { %5181 = vmatprep.subr.mxu1 %v5843_v4  ;;  %5183 = vmatprep.mubr.f32.mxu1 %v5977_v58  ;;  %v2358_v45 = vsub.f32 %v6067_v28, %v6075_v37 }
  0xa7   : > { %5182 = vmatpush3.msra.mxu1 %v5843_v4  ;;  %v2348_v4 = vsub.f32 %v6048_v9, %v6052_v3  ;;  %v6081_v40 = vand.u32 4294901760, %v6072_v32 }
  0xa8   : > { %5184 = vmatmul.mubr.f32.vlgmr.msra.gmra.mxu1 %v5982_v59  ;;  %v6096_v55 = vand.u32 4294901760, %v2358_v45 }
  0xa9   : > { %5200 = vmatprep.mubr.f32.mxu1 %v6045_v8  ;;  %v6056_v10 = vand.u32 4294901760, %v2348_v4  ;;  %v2368_v48 = vsub.f32 %v6072_v32, %v6081_v40 }
  0xab   : > { %5190 = vmatprep.mubr.f32.mxu0 %v6056_v10  ;;  %v6101_v58 = vand.u32 4294901760, %v2368_v48 }
 0x125   : > { %v5024_v13 = vpop.f32.mrf.mxu0 }
 0x126   : > { %v5031_v18 = vpop.f32.mrf.mxu1 }
 0x127   : > { %v309_v17 = vpop.f32.mrf.mxu0  ;;  %v407_v19 = vadd.f32 %v5031_v18, %v5024_v13 }
 0x128   : > { %v400_v21 = vpop.f32.mrf.mxu1 }
 0x129   : > { %v401_v24 = vadd.f32 %v400_v21, %v309_v17  ;;  %v5038_v25 = vpop.f32.mrf.mxu0 }
 0x12a   : > { %v490_v26 = vadd.f32 %v5038_v25, %v407_v19 }
 0x12b   : > { %v482_v27 = vpop.f32.mrf.mxu0 }
 0x12c   : > { %v483_v30 = vadd.f32 %v482_v27, %v401_v24  ;;  %v5045_v31 = vpop.f32.mrf.mxu1 }
 0x12d   : > { %v573_v33 = vadd.f32 %v5045_v31, %v490_v26 }
 0x12e   : > { %v564_v34 = vpop.f32.mrf.mxu1 }
 0x12f   : > { %v565_v35 = vadd.f32 %v564_v34, %v483_v30  ;;  %v5052_v36 = vpop.f32.mrf.mxu0 }
 0x130   : > { %v656_v39 = vadd.f32 %v5052_v36, %v573_v33 }
 0x131   : > { %v649_v41 = vpop.f32.mrf.mxu0 }
 0x132   : > { %v650_v42 = vadd.f32 %v649_v41, %v565_v35  ;;  %v5059_v43 = vpop.f32.mrf.mxu1 }
 0x133   : > { %v735_v44 = vadd.f32 %v5059_v43, %v656_v39 }
 0x134   : > { %v728_v47 = vpop.f32.mrf.mxu1 }
 0x135   : > { %v6090_v49 = vand.u32 4294901760, %v735_v44  ;;  %v729_v50 = vadd.f32 %v728_v47, %v650_v42  ;;  %v5066_v51 = vpop.f32.mrf.mxu0 }
 0x137   : > { %v2415_v52 = vsub.f32 %v735_v44, %v6090_v49  ;;  %v6093_v53 = vand.u32 4294901760, %v729_v50  ;;  %v817_v54 = vpop.f32.mrf.mxu0  ;;  %5186 = vmatprep.subr.mxu0 %v6090_v49 }
 0x138   : > { %v5073_v57 = vpop.f32.mrf.mxu1  ;;  %5187 = vmatpush3.msra.mxu0 %v6090_v49 }
 0x139   : > { %v2422_v59 = vsub.f32 %v729_v50, %v6093_v53  ;;  %v915_v60 = vadd.f32 %v5073_v57, %v5066_v51  ;;  %5188 = vmatprep.subr.mxu0 %v6093_v53  ;;  %v2416_v61 = vand.u32 4294901760, %v2415_v52 }
 0x13a   : > { %v908_v62 = vpop.f32.mrf.mxu1  ;;  %5189 = vmatpush3.msra.mxu0 %v6093_v53 }
 0x13b   : > { %v909_v63 = vadd.f32 %v908_v62, %v817_v54  ;;  %v5080_v0 = vpop.f32.mrf.mxu0  ;;  %5191 = vmatmul.mubr.f32.vlgmr.msra.gmra.mxu0 %v6096_v55  ;;  %5206 = vmatprep.subr.mxu0 %v2415_v52  ;;  %v2417_v2 = vsub.f32 %v2415_v52, %v2416_v61  ;;  %v2423_v5 = vand.u32 4294901760, %v2422_v59 }
 0x13c   : > { %v998_v6 = vadd.f32 %v5080_v0, %v915_v60  ;;  %5207 = vmatpush3.msra.mxu0 %v2415_v52  ;;  %5193 = vmatprep.mubr.f32.mxu0 %v6101_v58 }
 0x13d   : > { %v990_v7 = vpop.f32.mrf.mxu0  ;;  %5208 = vmatprep.subr.mxu0 %v2422_v59  ;;  %v2418_v4 = vand.u32 4294901760, %v2417_v2  ;;  %v2424_v11 = vsub.f32 %v2422_v59, %v2423_v5 }
 0x13e   : > { %v991_v12 = vadd.f32 %v990_v7, %v909_v63  ;;  %v5087_v13 = vpop.f32.mrf.mxu1  ;;  %5209 = vmatpush3.msra.mxu0 %v2422_v59 }
 0x13f   : > { %v1081_v14 = vadd.f32 %v5087_v13, %v998_v6  ;;  %5194 = vmatmul.mubr.f32.gmra.mxu0 %v6107_v1  ;;  %5196 = vmatprep.subr.mxu1 %v2418_v4  ;;  %v2425_v15 = vand.u32 4294901760, %v2424_v11 }
 0x140   : > { %v1072_v16 = vpop.f32.mrf.mxu1  ;;  %5226 = vmatprep.subr.mxu0 %v2416_v61  ;;  %5197 = vmatpush3.msra.mxu1 %v2418_v4 }
 0x141   : > { %v1073_v17 = vadd.f32 %v1072_v16, %v991_v12  ;;  %v5094_v18 = vpop.f32.mrf.mxu0  ;;  %5198 = vmatprep.subr.mxu1 %v2425_v15  ;;  %5210 = vmatprep.mubr.f32.mxu0 %v6048_v9 }
 0x142   : > { %v1164_v19 = vadd.f32 %v5094_v18, %v1081_v14  ;;  %5199 = vmatpush3.msra.mxu1 %v2425_v15 }
 0x143   : > { %v1157_v21 = vpop.f32.mrf.mxu0  ;;  %5201 = vmatmul.mubr.f32.vlgmr.msra.gmra.mxu1 %v6061_v20  ;;  %5211 = vmatmul.mubr.f32.vlgmr.msra.gmra.mxu0 %v6067_v28 }
 0x144   : > { %v5101_v23 = vpop.f32.mrf.mxu1  ;;  %v1158_v24 = vadd.f32 %v1157_v21, %v1073_v17  ;;  %5216 = vmatprep.subr.mxu1 %v6090_v49  ;;  %5227 = vmatpush3.msra.mxu0 %v2416_v61 }
 0x145   : > { %v1243_v25 = vadd.f32 %v5101_v23, %v1164_v19  ;;  %5217 = vmatpush3.msra.mxu1 %v6090_v49  ;;  %5228 = vmatprep.subr.mxu0 %v2423_v5 }
 0x146   : > { %v1236_v26 = vpop.f32.mrf.mxu1  ;;  %5218 = vmatprep.subr.mxu1 %v6093_v53  ;;  %5229 = vmatpush3.msra.mxu0 %v2423_v5 }
 0x147   : > { %v6116_v27 = vand.u32 4294901760, %v1243_v25  ;;  %v1237_v30 = vadd.f32 %v1236_v26, %v1158_v24  ;;  %5203 = vmatprep.mubr.f32.mxu1 %v6063_v22  ;;  %5213 = vmatprep.mubr.f32.mxu0 %v6072_v32  ;;  %v5108_v31 = vpop.f32.mrf.mxu0 }
 0x148   : > { %5219 = vmatpush3.msra.mxu1 %v6093_v53  ;;  %5214 = vmatmul.mubr.f32.gmra.mxu0 %v6078_v38 }
 0x149   : > { %v3003_v33 = vsub.f32 %v1243_v25, %v6116_v27  ;;  %v6122_v34 = vand.u32 4294901760, %v1237_v30  ;;  %5204 = vmatmul.mubr.f32.gmra.mxu1 %v6069_v29  ;;  %5236 = vmatprep.subr.mxu1 %v6090_v49  ;;  %v1325_v35 = vpop.f32.mrf.mxu0 }
 0x14a   : > { %5246 = vmatprep.subr.mxu0 %v6116_v27  ;;  %5220 = vmatprep.mubr.f32.mxu1 %v6052_v3  ;;  %v5115_v39 = vpop.f32.mrf.mxu1 }
 0x14b   : > { %v3010_v36 = vsub.f32 %v1237_v30, %v6122_v34  ;;  %v6131_v41 = vand.u32 4294901760, %v3003_v33  ;;  %5230 = vmatprep.mubr.f32.mxu0 %v6045_v8  ;;  %v1423_v42 = vadd.f32 %v5115_v39, %v5108_v31 }
 0x14c   : > { %5231 = vmatmul.mubr.f32.vlgmr.msra.gmra.mxu0 %v6061_v20  ;;  %v1416_v44 = vpop.f32.mrf.mxu1 }
 0x14d   : > { %v3005_v43 = vsub.f32 %v3003_v33, %v6131_v41  ;;  %5221 = vmatmul.mubr.f32.vlgmr.msra.gmra.mxu1 %v6075_v37  ;;  %5247 = vmatpush3.msra.mxu0 %v6116_v27  ;;  %v5122_v45 = vpop.f32.mrf.mxu0  ;;  %v3011_v50 = vand.u32 4294901760, %v3010_v36  ;;  %v1417_v52 = vadd.f32 %v1416_v44, %v1325_v35 }
 0x14e   : > { %5237 = vmatpush3.msra.mxu1 %v6090_v49  ;;  %5248 = vmatprep.subr.mxu0 %v6122_v34  ;;  %v1506_v48 = vadd.f32 %v5122_v45, %v1423_v42 }
 0x14f   : > { %v3006_v47 = vand.u32 4294901760, %v3005_v43  ;;  %5238 = vmatprep.subr.mxu1 %v6093_v53  ;;  %5249 = vmatpush3.msra.mxu0 %v6122_v34  ;;  %v1498_v51 = vpop.f32.mrf.mxu0  ;;  %v3012_v57 = vsub.f32 %v3010_v36, %v3011_v50 }
 0x150   : > { %5239 = vmatpush3.msra.mxu1 %v6093_v53  ;;  %5223 = vmatprep.mubr.f32.mxu1 %v6081_v40  ;;  %v5129_v54 = vpop.f32.mrf.mxu1  ;;  %v1499_v60 = vadd.f32 %v1498_v51, %v1417_v52 }
 0x151   : > { %5233 = vmatprep.mubr.f32.mxu0 %v6063_v22  ;;  %5256 = vmatprep.subr.mxu1 %v3006_v47  ;;  %v1589_v49 = vadd.f32 %v5129_v54, %v1506_v48  ;;  %v3013_v61 = vand.u32 4294901760, %v3012_v57 }
 0x152   : > { %5266 = vmatprep.subr.mxu0 %v3003_v33  ;;  %5224 = vmatmul.mubr.f32.gmra.mxu1 %v6086_v46  ;;  %v1580_v56 = vpop.f32.mrf.mxu1 }
 0x153   : > { %5234 = vmatmul.mubr.f32.gmra.mxu0 %v6069_v29  ;;  %5240 = vmatprep.mubr.f32.mxu1 %v6045_v8  ;;  %v5136_v59 = vpop.f32.mrf.mxu0  ;;  %v1581_v0 = vadd.f32 %v1580_v56, %v1499_v60 }
 0x154   : > { %5250 = vmatprep.mubr.f32.mxu0 %v6056_v10  ;;  %v1672_v53 = vadd.f32 %v5136_v59, %v1589_v49 }
 0x155   : > { %v1665_v2 = vpop.f32.mrf.mxu0 }
 0x156   : > { %5241 = vmatmul.mubr.f32.vlgmr.msra.gmra.mxu1 %v6061_v20  ;;  %v5143_v62 = vpop.f32.mrf.mxu1  ;;  %v1666_v6 = vadd.f32 %v1665_v2, %v1581_v0 }
 0x157   : > { %5251 = vmatmul.mubr.f32.vlgmr.msra.gmra.mxu0 %v6096_v55  ;;  %5257 = vmatpush3.msra.mxu1 %v3006_v47  ;;  %v1751_v63 = vadd.f32 %v5143_v62, %v1672_v53 }
 0x158   : > { %5267 = vmatpush3.msra.mxu0 %v3003_v33  ;;  %5258 = vmatprep.subr.mxu1 %v3013_v61  ;;  %v1744_v7 = vpop.f32.mrf.mxu1 }
 0x159   : > { %5268 = vmatprep.subr.mxu0 %v3010_v36  ;;  %5259 = vmatpush3.msra.mxu1 %v3013_v61  ;;  %v6152_v5 = vand.u32 4294901760, %v1751_v63  ;;  %v5150_v11 = vpop.f32.mrf.mxu0  ;;  %v1745_v12 = vadd.f32 %v1744_v7, %v1666_v6 }
 0x15a   : > { %5269 = vmatpush3.msra.mxu0 %v3010_v36  ;;  %5243 = vmatprep.mubr.f32.mxu1 %v6063_v22 }
 0x15b   : > { %5253 = vmatprep.mubr.f32.mxu0 %v6101_v58  ;;  %5276 = vmatprep.subr.mxu1 %v6116_v27  ;;  %v3591_v4 = vsub.f32 %v1751_v63, %v6152_v5  ;;  %v1833_v13 = vpop.f32.mrf.mxu0  ;;  %v6170_v16 = vand.u32 4294901760, %v1745_v12 }
 0x15c   : > { %5286 = vmatprep.subr.mxu0 %v6131_v41  ;;  %5244 = vmatmul.mubr.f32.gmra.mxu1 %v6069_v29  ;;  %v5157_v14 = vpop.f32.mrf.mxu1 }
 0x15d   : > { %5254 = vmatmul.mubr.f32.gmra.mxu0 %v6107_v1  ;;  %5260 = vmatprep.mubr.f32.mxu1 %v6045_v8  ;;  %v6168_v15 = vand.u32 4294901760, %v3591_v4  ;;  %v1931_v17 = vadd.f32 %v5157_v14, %v5150_v11  ;;  %v3598_v23 = vsub.f32 %v1745_v12, %v6170_v16 }
 0x15e   : > { %5270 = vmatprep.mubr.f32.mxu0 %v6048_v9  ;;  %v1924_v19 = vpop.f32.mrf.mxu1 }
 0x15f   : > { %v3593_v18 = vsub.f32 %v3591_v4, %v6168_v15  ;;  %v5164_v21 = vpop.f32.mrf.mxu0  ;;  %v3599_v33 = vand.u32 4294901760, %v3598_v23  ;;  %v1925_v35 = vadd.f32 %v1924_v19, %v1833_v13 }
 0x160   : > { %5261 = vmatmul.mubr.f32.vlgmr.msra.gmra.mxu1 %v6061_v20  ;;  %v2014_v24 = vadd.f32 %v5164_v21, %v1931_v17 }
 0x161   : > { %5271 = vmatmul.mubr.f32.vlgmr.msra.gmra.mxu0 %v6067_v28  ;;  %5277 = vmatpush3.msra.mxu1 %v6116_v27  ;;  %v3594_v25 = vand.u32 4294901760, %v3593_v18  ;;  %v2006_v26 = vpop.f32.mrf.mxu0 }
 0x162   : > { %5287 = vmatpush3.msra.mxu0 %v6131_v41  ;;  %5278 = vmatprep.subr.mxu1 %v6122_v34  ;;  %v5171_v30 = vpop.f32.mrf.mxu1  ;;  %v3600_v41 = vsub.f32 %v3598_v23, %v3599_v33  ;;  %v2007_v42 = vadd.f32 %v2006_v26, %v1925_v35 }
 0x163   : > { %5288 = vmatprep.subr.mxu0 %v3011_v50  ;;  %5279 = vmatpush3.msra.mxu1 %v6122_v34  ;;  %v2097_v31 = vadd.f32 %v5171_v30, %v2014_v24 }
 0x164   : > { %5289 = vmatpush3.msra.mxu0 %v3011_v50  ;;  %5263 = vmatprep.mubr.f32.mxu1 %v6063_v22  ;;  %v3601_v43 = vand.u32 4294901760, %v3600_v41 }
 0x165   : > { %5273 = vmatprep.mubr.f32.mxu0 %v6072_v32  ;;  %5296 = vmatprep.subr.mxu1 %v6116_v27  ;;  %v5178_v36 = vpop.f32.mrf.mxu0 }
 0x166   : > { %5264 = vmatmul.mubr.f32.gmra.mxu1 %v6069_v29  ;;  %5274 = vmatmul.mubr.f32.gmra.mxu0 %v6078_v38  ;;  %v2180_v39 = vadd.f32 %v5178_v36, %v2097_v31 }
 0x167   : > { %5306 = vmatprep.subr.mxu0 %v6152_v5  ;;  %5280 = vmatprep.mubr.f32.mxu1 %v6052_v3  ;;  %v2173_v47 = vpop.f32.mrf.mxu0 }
 0x168   : > { %5290 = vmatprep.mubr.f32.mxu0 %v6045_v8 }
 0x16a   : > { %5281 = vmatmul.mubr.f32.vlgmr.msra.gmra.mxu1 %v6075_v37  ;;  %5291 = vmatmul.mubr.f32.vlgmr.msra.gmra.mxu0 %v6061_v20 }
 0x16b   : > { %5297 = vmatpush3.msra.mxu1 %v6116_v27  ;;  %5307 = vmatpush3.msra.mxu0 %v6152_v5  ;;  %v2088_v27 = vpop.f32.mrf.mxu1 }
 0x16c   : > { %5298 = vmatprep.subr.mxu1 %v6122_v34  ;;  %5308 = vmatprep.subr.mxu0 %v6170_v16  ;;  %v2089_v45 = vadd.f32 %v2088_v27, %v2007_v42 }
 0x16d   : > { %5299 = vmatpush3.msra.mxu1 %v6122_v34  ;;  %5309 = vmatpush3.msra.mxu0 %v6170_v16  ;;  %v5185_v34 = vpop.f32.mrf.mxu1 }
 0x16e   : > { %5283 = vmatprep.mubr.f32.mxu1 %v6081_v40  ;;  %5293 = vmatprep.mubr.f32.mxu0 %v6063_v22  ;;  %v2259_v44 = vadd.f32 %v5185_v34, %v2180_v39  ;;  %v2174_v50 = vadd.f32 %v2173_v47, %v2089_v45 }
 0x16f   : > { %5316 = vmatprep.subr.mxu1 %v3594_v25  ;;  %5326 = vmatprep.subr.mxu0 %v3591_v4  ;;  %v2252_v51 = vpop.f32.mrf.mxu1 }
 0x170   : > { %5284 = vmatmul.mubr.f32.gmra.mxu1 %v6086_v46  ;;  %5294 = vmatmul.mubr.f32.gmra.mxu0 %v6069_v29  ;;  %v6198_v48 = vand.u32 4294901760, %v2259_v44  ;;  %v2253_v54 = vadd.f32 %v2252_v51, %v2174_v50 }
 0x171   : > { %5300 = vmatprep.mubr.f32.mxu1 %v6045_v8  ;;  %5310 = vmatprep.mubr.f32.mxu0 %v6056_v10 }
 0x172   : > { %v4179_v52 = vsub.f32 %v2259_v44, %v6198_v48  ;;  %v6214_v56 = vand.u32 4294901760, %v2253_v54 }
 0x174   : > { %5301 = vmatmul.mubr.f32.vlgmr.msra.gmra.mxu1 %v6061_v20  ;;  %5311 = vmatmul.mubr.f32.vlgmr.msra.gmra.mxu0 %v6096_v55  ;;  %v4180_v49 = vand.u32 4294901760, %v4179_v52  ;;  %v4186_v59 = vsub.f32 %v2253_v54, %v6214_v56 }
 0x175   : > { %5317 = vmatpush3.msra.mxu1 %v3594_v25  ;;  %5327 = vmatpush3.msra.mxu0 %v3591_v4 }
 0x176   : > { %5318 = vmatprep.subr.mxu1 %v3601_v43  ;;  %5328 = vmatprep.subr.mxu0 %v3598_v23  ;;  %v4181_v57 = vsub.f32 %v4179_v52, %v4180_v49  ;;  %v4187_v53 = vand.u32 4294901760, %v4186_v59 }
 0x177   : > { %5319 = vmatpush3.msra.mxu1 %v3601_v43  ;;  %5329 = vmatpush3.msra.mxu0 %v3598_v23 }
 0x178   : > { %5303 = vmatprep.mubr.f32.mxu1 %v6063_v22  ;;  %5313 = vmatprep.mubr.f32.mxu0 %v6101_v58  ;;  %v4182_v60 = vand.u32 4294901760, %v4181_v57  ;;  %v4188_v61 = vsub.f32 %v4186_v59, %v4187_v53 }
 0x179   : > { %5336 = vmatprep.subr.mxu1 %v6152_v5  ;;  %5346 = vmatprep.subr.mxu0 %v6168_v15 }
 0x17a   : > { %5304 = vmatmul.mubr.f32.gmra.mxu1 %v6069_v29  ;;  %5314 = vmatmul.mubr.f32.gmra.mxu0 %v6107_v1  ;;  %v4189_v62 = vand.u32 4294901760, %v4188_v61 }
 0x17b   : > { %5320 = vmatprep.mubr.f32.mxu1 %v6045_v8  ;;  %5330 = vmatprep.mubr.f32.mxu0 %v6048_v9 }
 0x17e   : > { %5321 = vmatmul.mubr.f32.vlgmr.msra.gmra.mxu1 %v6061_v20  ;;  %5331 = vmatmul.mubr.f32.vlgmr.msra.gmra.mxu0 %v6067_v28 }
 0x17f   : > { %5337 = vmatpush3.msra.mxu1 %v6152_v5  ;;  %5347 = vmatpush3.msra.mxu0 %v6168_v15 }
 0x180   : > { %5338 = vmatprep.subr.mxu1 %v6170_v16  ;;  %5348 = vmatprep.subr.mxu0 %v3599_v33 }
 0x181   : > { %5339 = vmatpush3.msra.mxu1 %v6170_v16  ;;  %5349 = vmatpush3.msra.mxu0 %v3599_v33 }
 0x182   : > { %5323 = vmatprep.mubr.f32.mxu1 %v6063_v22  ;;  %5333 = vmatprep.mubr.f32.mxu0 %v6072_v32 }
 0x183   : > { %5356 = vmatprep.subr.mxu1 %v6152_v5  ;;  %5324 = vmatmul.mubr.f32.gmra.mxu1 %v6069_v29 }
 0x184   : > { %5334 = vmatmul.mubr.f32.gmra.mxu0 %v6078_v38  ;;  %5366 = vmatprep.subr.mxu0 %v6198_v48 }
 0x185   : > { %5340 = vmatprep.mubr.f32.mxu1 %v6052_v3  ;;  %5350 = vmatprep.mubr.f32.mxu0 %v6045_v8 }
 0x187   : > { %5341 = vmatmul.mubr.f32.vlgmr.msra.gmra.mxu1 %v6075_v37 }
 0x188   : > { %5351 = vmatmul.mubr.f32.vlgmr.msra.gmra.mxu0 %v6061_v20  ;;  %5357 = vmatpush3.msra.mxu1 %v6152_v5 }
 0x189   : > { %5367 = vmatpush3.msra.mxu0 %v6198_v48  ;;  %5358 = vmatprep.subr.mxu1 %v6170_v16 }
 0x18a   : > { %5368 = vmatprep.subr.mxu0 %v6214_v56  ;;  %5359 = vmatpush3.msra.mxu1 %v6170_v16 }
 0x18b   : > { %5369 = vmatpush3.msra.mxu0 %v6214_v56  ;;  %5343 = vmatprep.mubr.f32.mxu1 %v6081_v40 }
 0x18c   : > { %5353 = vmatprep.mubr.f32.mxu0 %v6063_v22  ;;  %5376 = vmatprep.subr.mxu1 %v4182_v60 }
 0x18d   : > { %5386 = vmatprep.subr.mxu0 %v4179_v52  ;;  %5344 = vmatmul.mubr.f32.gmra.mxu1 %v6086_v46 }
 0x18e   : > { %5354 = vmatmul.mubr.f32.gmra.mxu0 %v6069_v29  ;;  %5360 = vmatprep.mubr.f32.mxu1 %v6045_v8 }
 0x18f   : > { %5370 = vmatprep.mubr.f32.mxu0 %v6056_v10 }
 0x191   : > { %5361 = vmatmul.mubr.f32.vlgmr.msra.gmra.mxu1 %v6061_v20 }
 0x192   : > { %5371 = vmatmul.mubr.f32.vlgmr.msra.gmra.mxu0 %v6096_v55  ;;  %5377 = vmatpush3.msra.mxu1 %v4182_v60 }
 0x193   : > { %5387 = vmatpush3.msra.mxu0 %v4179_v52  ;;  %5378 = vmatprep.subr.mxu1 %v4189_v62 }
 0x194   : > { %5388 = vmatprep.subr.mxu0 %v4186_v59  ;;  %5379 = vmatpush3.msra.mxu1 %v4189_v62 }
 0x195   : > { %5389 = vmatpush3.msra.mxu0 %v4186_v59  ;;  %5363 = vmatprep.mubr.f32.mxu1 %v6063_v22 }
 0x196   : > { %5373 = vmatprep.mubr.f32.mxu0 %v6101_v58  ;;  %5396 = vmatprep.subr.mxu1 %v6198_v48 }
 0x197   : > { %5406 = vmatprep.subr.mxu0 %v4180_v49  ;;  %5364 = vmatmul.mubr.f32.gmra.mxu1 %v6069_v29 }
 0x198   : > { %5374 = vmatmul.mubr.f32.gmra.mxu0 %v6107_v1  ;;  %5380 = vmatprep.mubr.f32.mxu1 %v6045_v8 }
 0x199   : > { %5390 = vmatprep.mubr.f32.mxu0 %v6048_v9 }
 0x19b   : > { %5381 = vmatmul.mubr.f32.vlgmr.msra.gmra.mxu1 %v6061_v20 }
 0x19c   : > { %5391 = vmatmul.mubr.f32.vlgmr.msra.gmra.mxu0 %v6067_v28  ;;  %5397 = vmatpush3.msra.mxu1 %v6198_v48 }
 0x19d   : > { %5407 = vmatpush3.msra.mxu0 %v4180_v49  ;;  %5398 = vmatprep.subr.mxu1 %v6214_v56 }
 0x19e   : > { %5408 = vmatprep.subr.mxu0 %v4187_v53  ;;  %5399 = vmatpush3.msra.mxu1 %v6214_v56 }
 0x19f   : > { %5409 = vmatpush3.msra.mxu0 %v4187_v53  ;;  %5383 = vmatprep.mubr.f32.mxu1 %v6063_v22 }
 0x1a0   : > { %5416 = vmatprep.subr.mxu1 %v6198_v48  ;;  %5384 = vmatmul.mubr.f32.gmra.mxu1 %v6069_v29 }
 0x1a1   : > { %5393 = vmatprep.mubr.f32.mxu0 %v6072_v32  ;;  %5400 = vmatprep.mubr.f32.mxu1 %v6052_v3 }
 0x1a2   : > { %5394 = vmatmul.mubr.f32.gmra.mxu0 %v6078_v38 }
 0x1a3   : > { %5410 = vmatprep.mubr.f32.mxu0 %v6045_v8 }
 0x1a4   : > { %5401 = vmatmul.mubr.f32.vlgmr.msra.gmra.mxu1 %v6075_v37 }
 0x1a5   : > { %5417 = vmatpush3.msra.mxu1 %v6198_v48  ;;  %5403 = vmatprep.mubr.f32.mxu1 %v6081_v40 }
 0x1a6   : > { %5418 = vmatprep.subr.mxu1 %v6214_v56  ;;  %5411 = vmatmul.mubr.f32.vlgmr.msra.gmra.mxu0 %v6061_v20 }
 0x1a7   : > { %5419 = vmatpush3.msra.mxu1 %v6214_v56  ;;  %5413 = vmatprep.mubr.f32.mxu0 %v6063_v22 }
 0x1a8   : > { %5404 = vmatmul.mubr.f32.gmra.mxu1 %v6086_v46 }
 0x1a9   : > { %5420 = vmatprep.mubr.f32.mxu1 %v6045_v8 }
 0x1aa   : > { %5414 = vmatmul.mubr.f32.gmra.mxu0 %v6069_v29 }
 0x1ac   : > { %5421 = vmatmul.mubr.f32.vlgmr.msra.gmra.mxu1 %v6061_v20 }
 0x1ad   : > { %5423 = vmatprep.mubr.f32.mxu1 %v6063_v22 }
 0x1b0   : > { %5424 = vmatmul.mubr.f32.gmra.mxu1 %v6069_v29 }
 0x1fb   : > { %v5192_v9 = vpop.f32.mrf.mxu0 }
 0x1fd   : > { %v2351_v3 = vpop.f32.mrf.mxu0 }
 0x1ff   : > { %v5195_v10 = vpop.f32.mrf.mxu0 }
 0x201   : > { %v2371_v28 = vpop.f32.mrf.mxu0 }
 0x203   : > { %v5202_v32 = vpop.f32.mrf.mxu1  ;;  %v5212_v37 = vpop.f32.mrf.mxu0 }
 0x204   : > { %v2469_v8 = vadd.f32 %v5202_v32, %v5192_v9 }
 0x205   : > { %v2462_v38 = vpop.f32.mrf.mxu1  ;;  %v2556_v40 = vpop.f32.mrf.mxu0 }
 0x206   : > { %v2463_v20 = vadd.f32 %v2462_v38, %v2351_v3  ;;  %v2564_v22 = vadd.f32 %v5212_v37, %v2469_v8 }
 0x208   : > { %v5215_v55 = vpop.f32.mrf.mxu0  ;;  %v2557_v6 = vadd.f32 %v2556_v40, %v2463_v20 }
 0x209   : > { %v5205_v46 = vpop.f32.mrf.mxu1 }
 0x20a   : > { %v2570_v58 = vpop.f32.mrf.mxu0  ;;  %v2481_v5 = vadd.f32 %v5205_v46, %v5195_v10 }
 0x20b   : > { %v2474_v1 = vpop.f32.mrf.mxu1 }
 0x20c   : > { %v5232_v63 = vpop.f32.mrf.mxu0  ;;  %v2475_v11 = vadd.f32 %v2474_v1, %v2371_v28  ;;  %v2578_v15 = vadd.f32 %v5215_v55, %v2481_v5 }
 0x20d   : > { %v5222_v0 = vpop.f32.mrf.mxu1 }
 0x20e   : > { %v2753_v29 = vpop.f32.mrf.mxu0  ;;  %v2661_v7 = vadd.f32 %v5222_v0, %v2564_v22  ;;  %v2571_v19 = vadd.f32 %v2570_v58, %v2475_v11 }
 0x20f   : > { %v2652_v2 = vpop.f32.mrf.mxu1 }
 0x210   : > { %v2653_v12 = vadd.f32 %v2652_v2, %v2557_v6  ;;  %v2760_v16 = vadd.f32 %v5232_v63, %v2661_v7 }
 0x212   : > { %v5225_v4 = vpop.f32.mrf.mxu1  ;;  %v2754_v23 = vadd.f32 %v2753_v29, %v2653_v12 }
 0x213   : > { %v5235_v13 = vpop.f32.mrf.mxu0  ;;  %v2677_v21 = vadd.f32 %v5225_v4, %v2578_v15 }
 0x214   : > { %v2668_v14 = vpop.f32.mrf.mxu1 }
 0x215   : > { %v2765_v17 = vpop.f32.mrf.mxu0  ;;  %v2669_v30 = vadd.f32 %v2668_v14, %v2571_v19  ;;  %v2772_v35 = vadd.f32 %v5235_v13, %v2677_v21 }
 0x216   : > { %v5242_v18 = vpop.f32.mrf.mxu1 }
 0x217   : > { %v2851_v24 = vadd.f32 %v5242_v18, %v2760_v16  ;;  %v5252_v25 = vpop.f32.mrf.mxu0  ;;  %v2766_v36 = vadd.f32 %v2765_v17, %v2669_v30 }
 0x218   : > { %v2844_v26 = vpop.f32.mrf.mxu1 }
 0x219   : > { %4632 = vst.msk [vmem:[%s6275_s9 + $0x8] sm:$0xff] %vm4630_vm1, %v2851_v24  ;;  %v2845_v31 = vadd.f32 %v2844_v26, %v2754_v23  ;;  %v2939_v33 = vpop.f32.mrf.mxu0 }
 0x21b   : > { %4631 = vst.msk [vmem:[%s6275_s9] sm:$0xff] %vm4630_vm1, %v2845_v31 }
 0x21c   : > { %v5245_v27 = vpop.f32.mrf.mxu1 }
 0x21d   : > { %v2863_v39 = vadd.f32 %v5245_v27, %v2772_v35  ;;  %v5255_v41 = vpop.f32.mrf.mxu0 }
 0x21e   : > { %v2856_v42 = vpop.f32.mrf.mxu1 }
 0x21f   : > { %4634 = vst.msk [vmem:[%s6275_s9 + $0x18] sm:$0xff] %vm4630_vm1, %v2863_v39  ;;  %v2857_v34 = vadd.f32 %v2856_v42, %v2766_v36  ;;  %v2959_v43 = vpop.f32.mrf.mxu0 }
 0x220   : > { %v5262_v44 = vpop.f32.mrf.mxu1 }
 0x221   : > { %4633 = vst.msk [vmem:[%s6275_s9 + $0x10] sm:$0xff] %vm4630_vm1, %v2857_v34  ;;  %v5272_v45 = vpop.f32.mrf.mxu0  ;;  %v3057_v49 = vadd.f32 %v5262_v44, %v5252_v25 }
 0x222   : > { %v3050_v47 = vpop.f32.mrf.mxu1 }
 0x223   : > { %v3144_v48 = vpop.f32.mrf.mxu0  ;;  %v3051_v59 = vadd.f32 %v3050_v47, %v2939_v33  ;;  %v3152_v61 = vadd.f32 %v5272_v45, %v3057_v49 }
 0x225   : > { %v3145_v9 = vadd.f32 %v3144_v48, %v3051_v59 }
 0x226   : > { %v5265_v50 = vpop.f32.mrf.mxu1  ;;  %v5275_v51 = vpop.f32.mrf.mxu0 }
 0x227   : > { %v3069_v62 = vadd.f32 %v5265_v50, %v5255_v41 }
 0x228   : > { %v3062_v52 = vpop.f32.mrf.mxu1  ;;  %v3158_v54 = vpop.f32.mrf.mxu0 }
 0x229   : > { %v3063_v32 = vadd.f32 %v3062_v52, %v2959_v43  ;;  %v3166_v55 = vadd.f32 %v5275_v51, %v3069_v62 }
 0x22a   : > { %v5282_v56 = vpop.f32.mrf.mxu1  ;;  %v5292_v57 = vpop.f32.mrf.mxu0 }
 0x22b   : > { %v3249_v3 = vadd.f32 %v5282_v56, %v3152_v61  ;;  %v3159_v1 = vadd.f32 %v3158_v54, %v3063_v32 }
 0x22c   : > { %v3240_v60 = vpop.f32.mrf.mxu1  ;;  %v3341_v53 = vpop.f32.mrf.mxu0 }
 0x22d   : > { %v3241_v37 = vadd.f32 %v3240_v60, %v3145_v9  ;;  %v3348_v46 = vadd.f32 %v5292_v57, %v3249_v3 }
 0x22f   : > { %v3342_v20 = vadd.f32 %v3341_v53, %v3241_v37 }
 0x230   : > { %v5285_v10 = vpop.f32.mrf.mxu1  ;;  %v5295_v28 = vpop.f32.mrf.mxu0 }
 0x231   : > { %v3265_v63 = vadd.f32 %v5285_v10, %v3166_v55 }
 0x232   : > { %v3256_v38 = vpop.f32.mrf.mxu1  ;;  %v3353_v40 = vpop.f32.mrf.mxu0 }
 0x233   : > { %v3257_v29 = vadd.f32 %v3256_v38, %v3159_v1  ;;  %v3360_v6 = vadd.f32 %v5295_v28, %v3265_v63 }
 0x234   : > { %v5302_v58 = vpop.f32.mrf.mxu1  ;;  %v5312_v8 = vpop.f32.mrf.mxu0 }
 0x235   : > { %v3439_v0 = vadd.f32 %v5302_v58, %v3348_v46  ;;  %v3354_v11 = vadd.f32 %v3353_v40, %v3257_v29 }
 0x236   : > { %v3432_v22 = vpop.f32.mrf.mxu1  ;;  %v3527_v2 = vpop.f32.mrf.mxu0 }
 0x237   : > { %4636 = vst.msk [vmem:[%s6275_s9 + $0x28] sm:$0xff] %vm4630_vm1, %v3439_v0  ;;  %v3433_v5 = vadd.f32 %v3432_v22, %v3342_v20 }
 0x239   : > { %4635 = vst.msk [vmem:[%s6275_s9 + $0x20] sm:$0xff] %vm4630_vm1, %v3433_v5 }
 0x23a   : > { %v5305_v7 = vpop.f32.mrf.mxu1  ;;  %v5315_v4 = vpop.f32.mrf.mxu0 }
 0x23b   : > { %v3451_v12 = vadd.f32 %v5305_v7, %v3360_v6 }
 0x23c   : > { %v3444_v13 = vpop.f32.mrf.mxu1  ;;  %v3547_v14 = vpop.f32.mrf.mxu0 }
 0x23d   : > { %4638 = vst.msk [vmem:[%s6275_s9 + $0x38] sm:$0xff] %vm4630_vm1, %v3451_v12  ;;  %v3445_v15 = vadd.f32 %v3444_v13, %v3354_v11 }
 0x23e   : > { %v5322_v16 = vpop.f32.mrf.mxu1  ;;  %v5332_v17 = vpop.f32.mrf.mxu0 }
 0x23f   : > { %4637 = vst.msk [vmem:[%s6275_s9 + $0x30] sm:$0xff] %vm4630_vm1, %v3445_v15  ;;  %v3645_v25 = vadd.f32 %v5322_v16, %v5312_v8 }
 0x240   : > { %v3638_v18 = vpop.f32.mrf.mxu1  ;;  %v3732_v19 = vpop.f32.mrf.mxu0 }
 0x241   : > { %v3639_v31 = vadd.f32 %v3638_v18, %v3527_v2  ;;  %v3740_v27 = vadd.f32 %v5332_v17, %v3645_v25 }
 0x243   : > { %v5325_v21 = vpop.f32.mrf.mxu1  ;;  %v3733_v41 = vadd.f32 %v3732_v19, %v3639_v31 }
 0x244   : > { %v5335_v23 = vpop.f32.mrf.mxu0  ;;  %v3657_v39 = vadd.f32 %v5325_v21, %v5315_v4 }
 0x245   : > { %v3650_v24 = vpop.f32.mrf.mxu1 }
 0x246   : > { %v3746_v26 = vpop.f32.mrf.mxu0  ;;  %v3651_v43 = vadd.f32 %v3650_v24, %v3547_v14  ;;  %v3754_v48 = vadd.f32 %v5335_v23, %v3657_v39 }
 0x247   : > { %v5342_v30 = vpop.f32.mrf.mxu1 }
 0x248   : > { %v5352_v33 = vpop.f32.mrf.mxu0  ;;  %v3837_v42 = vadd.f32 %v5342_v30, %v3740_v27  ;;  %v3747_v54 = vadd.f32 %v3746_v26, %v3651_v43 }
 0x249   : > { %v3828_v35 = vpop.f32.mrf.mxu1 }
 0x24a   : > { %v3929_v36 = vpop.f32.mrf.mxu0  ;;  %v3829_v44 = vadd.f32 %v3828_v35, %v3733_v41  ;;  %v3936_v50 = vadd.f32 %v5352_v33, %v3837_v42 }
 0x24c   : > { %v3930_v56 = vadd.f32 %v3929_v36, %v3829_v44 }
 0x24d   : > { %v5345_v34 = vpop.f32.mrf.mxu1 }
 0x24e   : > { %v5355_v45 = vpop.f32.mrf.mxu0  ;;  %v3853_v49 = vadd.f32 %v5345_v34, %v3754_v48 }
 0x24f   : > { %v3844_v47 = vpop.f32.mrf.mxu1 }
 0x250   : > { %v3941_v51 = vpop.f32.mrf.mxu0  ;;  %v3845_v53 = vadd.f32 %v3844_v47, %v3747_v54  ;;  %v3948_v9 = vadd.f32 %v5355_v45, %v3853_v49 }
 0x251   : > { %v5362_v52 = vpop.f32.mrf.mxu1 }
 0x252   : > { %v4027_v57 = vadd.f32 %v5362_v52, %v3936_v50  ;;  %v5372_v59 = vpop.f32.mrf.mxu0  ;;  %v3942_v10 = vadd.f32 %v3941_v51, %v3845_v53 }
 0x253   : > { %v4020_v60 = vpop.f32.mrf.mxu1 }
 0x254   : > { %4640 = vst.msk [vmem:[%s6275_s9 + $0x48] sm:$0xff] %vm4630_vm1, %v4027_v57  ;;  %v4021_v61 = vadd.f32 %v4020_v60, %v3930_v56  ;;  %v4115_v62 = vpop.f32.mrf.mxu0 }
 0x256   : > { %4639 = vst.msk [vmem:[%s6275_s9 + $0x40] sm:$0xff] %vm4630_vm1, %v4021_v61 }
 0x257   : > { %v5365_v3 = vpop.f32.mrf.mxu1 }
 0x258   : > { %v4039_v28 = vadd.f32 %v5365_v3, %v3948_v9  ;;  %v5375_v32 = vpop.f32.mrf.mxu0 }
 0x259   : > { %v4032_v37 = vpop.f32.mrf.mxu1 }
 0x25a   : > { %4642 = vst.msk [vmem:[%s6275_s9 + $0x58] sm:$0xff] %vm4630_vm1, %v4039_v28  ;;  %v4033_v38 = vadd.f32 %v4032_v37, %v3942_v10  ;;  %v4135_v40 = vpop.f32.mrf.mxu0 }
 0x25b   : > { %v5382_v55 = vpop.f32.mrf.mxu1 }
 0x25c   : > { %4641 = vst.msk [vmem:[%s6275_s9 + $0x50] sm:$0xff] %vm4630_vm1, %v4033_v38  ;;  %v5392_v46 = vpop.f32.mrf.mxu0  ;;  %v4233_v63 = vadd.f32 %v5382_v55, %v5372_v59 }
 0x25d   : > { %v4226_v58 = vpop.f32.mrf.mxu1 }
 0x25e   : > { %v4320_v8 = vpop.f32.mrf.mxu0  ;;  %v4227_v22 = vadd.f32 %v4226_v58, %v4115_v62  ;;  %v4328_v5 = vadd.f32 %v5392_v46, %v4233_v63 }
 0x260   : > { %v5385_v1 = vpop.f32.mrf.mxu1  ;;  %v4321_v11 = vadd.f32 %v4320_v8, %v4227_v22 }
 0x261   : > { %v4245_v6 = vadd.f32 %v5385_v1, %v5375_v32 }
 0x262   : > { %v4238_v20 = vpop.f32.mrf.mxu1  ;;  %v5395_v0 = vpop.f32.mrf.mxu0 }
 0x263   : > { %v4239_v12 = vadd.f32 %v4238_v20, %v4135_v40  ;;  %v4342_v16 = vadd.f32 %v5395_v0, %v4245_v6 }
 0x264   : > { %v4334_v2 = vpop.f32.mrf.mxu0  ;;  %v5402_v29 = vpop.f32.mrf.mxu1 }
 0x265   : > { %v4425_v13 = vadd.f32 %v5402_v29, %v4328_v5  ;;  %v4335_v21 = vadd.f32 %v4334_v2, %v4239_v12 }
 0x266   : > { %v4416_v7 = vpop.f32.mrf.mxu1  ;;  %v5412_v4 = vpop.f32.mrf.mxu0 }
 0x267   : > { %v4417_v17 = vadd.f32 %v4416_v7, %v4321_v11  ;;  %v4524_v23 = vadd.f32 %v5412_v4, %v4425_v13 }
 0x268   : > { %v5405_v14 = vpop.f32.mrf.mxu1  ;;  %v4517_v15 = vpop.f32.mrf.mxu0 }
 0x269   : > { %v4441_v24 = vadd.f32 %v5405_v14, %v4342_v16  ;;  %v4518_v26 = vadd.f32 %v4517_v15, %v4417_v17 }
 0x26a   : > { %v4432_v18 = vpop.f32.mrf.mxu1  ;;  %v5415_v19 = vpop.f32.mrf.mxu0 }
 0x26b   : > { %v4433_v30 = vadd.f32 %v4432_v18, %v4335_v21  ;;  %v4536_v27 = vadd.f32 %v5415_v19, %v4441_v24 }
 0x26c   : > { %v5422_v25 = vpop.f32.mrf.mxu1  ;;  %v4529_v33 = vpop.f32.mrf.mxu0 }
 0x26d   : > { %v4615_v31 = vadd.f32 %v5422_v25, %v4524_v23  ;;  %v4530_v41 = vadd.f32 %v4529_v33, %v4433_v30 }
 0x26e   : > { %v4608_v35 = vpop.f32.mrf.mxu1 }
 0x26f   : > { %4644 = vst.msk [vmem:[%s6275_s9 + $0x68] sm:$0xff] %vm4630_vm1, %v4615_v31  ;;  %v4609_v36 = vadd.f32 %v4608_v35, %v4518_v26 }
 0x270   : > { %v5425_v39 = vpop.f32.mrf.mxu1 }
 0x271   : > { %4643 = vst.msk [vmem:[%s6275_s9 + $0x60] sm:$0xff] %vm4630_vm1, %v4609_v36  ;;  %v4627_v42 = vadd.f32 %v5425_v39, %v4536_v27 }
 0x272   : > { %v4620_v34 = vpop.f32.mrf.mxu1 }
 0x273   : > { %4646 = vst.msk [vmem:[%s6275_s9 + $0x78] sm:$0xff] %vm4630_vm1, %v4627_v42  ;;  %v4621_v43 = vadd.f32 %v4620_v34, %v4530_v41 }
 0x275   : > { %4645 = vst.msk [vmem:[%s6275_s9 + $0x70] sm:$0xff] %vm4630_vm1, %v4621_v43 }
 0x276   : > { %5590 = shalt.err (!%p5587_p0)
}
 0x277   : > { %s5591_s5 = scalar_lea.hbm %s6310_s22, 2048  ;;  %s5595_s26 = scalar_lea.hbm %s6362_s3, 4096 }
 0x278   : > { %p5592_p2 = scmp.ne.s32.totalorder %s6310_s22, %s5591_s5  ;;  %p5596_p6 = scmp.lt.s32.totalorder %s6310_s22, %s6362_s3 }
 0x279   : > { %p5597_p13 = scmp.lt.s32.totalorder %s5595_s26, %s5591_s5 }
 0x27a   : > { %p5593_p3 = pnand %p5592_p2, %p6380_p11 }
 0x27b   : > { %p5598_p8 = por %p5597_p13, %p5596_p6 }
 0x27c   : > { %p5594_p7 = pneg %p5593_p3 }
 0x27e   : > { %p5599_p4 = pnand %p5598_p8, %p5594_p7 }
 0x280   : > { %5602 = shalt.err (!%p5599_p4)
}
 0x281   : > { %s5657_s23 = smov 128   ;;  %s5658_s9 = smov 8  }
 0x282   : > { %5436 = dma.vmem_to_hbm [thread:$0]  (%p6380_p11), %s6312_s17, 2048, %s6310_s22, %s4648_s16, %s5657_s23, %s5657_s23, %s5658_s9  }
 0x283 PF: > { %s4677_s11 = sand.u32 1, %s5637_s12   ;;  %p6381_p12 = scmp.ne.s32.totalorder %s6370_s25, 0 }
 0x284   : > { %p6382_p9 = scmp.ge.s32.totalorder %s5649_s15, 2  ;;  %s4678_s4 = scalar_lea.sflag [#allocation4], %s4677_s11 }
 0x286   : > { %p5450_p10 = pnand %p6382_p9, %p6381_p12 }
 0x288   : > { %p5451_p1 = pneg %p5450_p10 }
 0x28a   : > { %5632 = dma.done.wait (%p5451_p1), %s4678_s4, 2048  }
 0x28b   : > { %5634 = vsyncadd (%p5451_p1), %s4678_s4, 4294965248  ;;  %p15_p5 = scmp.ge.s32.totalorder %s5704_s18, 4   ;;  %s6383_s12 = smov %s5641_s13 }
 0x28c   : > { %s6384_s13 = smov %s5645_s14  ;;  %s6385_s14 = smov %s5716_s21 }
 0x28d   : > { %s6386_s15 = smov %s5704_s18  ;;  %17 = sbr.rel (!%p15_p5) target bundleno = 5 (0x5), region = 84 }
 0x292   :  { %4683 = vsyncpa [#allocation3], 1 }
 0x293   :  { %4685 = vsyncpa [#allocation3 + $0x1], 1 }
 0x294   :  { %4686 = vsyncpa [#allocation6], 1 }
 0x295   :  { %4687 = vsyncpa [#allocation4], 1 }
 0x296   :  { %4689 = vsyncpa [#allocation4 + $0x1], 1 }

</bundles_post_ra>
